<compile_context>
chip_gen: v7x
topology: tpu7x:2x2x1
jax: 0.10.0
libtpu: 0.0.40
codegen_flags: <defaults>
</compile_context>

<pallas_src>
import math
import functools

import jax
import jax.numpy as jnp
from jax import lax
from jax.experimental import pallas as pl
from jax.experimental.pallas import tpu as pltpu


# ----------------------------- Pallas kernel ------------------------------ #

def _linformer_kernel(x_ref, w_ref, o_ref, *, batch, seq_len, dim, heads,
                      dim_head, k, offs):
    """Whole forward pass in one invocation, everything resident in VMEM.

    x_ref : (B*N, D)
    w_ref : packed slab (rows, C) holding wq(scaled)|wk|wv|wo|pk_tiled|pv_tiled|
            head-mask|sum-spread|bo, every segment starting at an 8-aligned row.
    o_ref : (B*N, D)
    """
    B, N, D, H, Dh, K = batch, seq_len, dim, heads, dim_head, k
    HD, HK = H * Dh, H * K
    f32 = jnp.float32

    def seg(name, rows, cols):
        r0 = offs[name]                     # static, 8-aligned row offset
        return w_ref[r0:r0 + rows, :cols]

    wq = seg("wq", D, HD)                   # 1/sqrt(Dh) already folded in
    wk = seg("wk", D, HD)
    wv = seg("wv", D, HD)
    wo = seg("wo", HD, D)
    pk_t = seg("pk", N, HK)                 # proj_k tiled over heads along lanes
    pv_t = seg("pv", N, HK)
    mask = seg("mask", HD, HK)              # 1.0 iff column-head == lane-head
    ssum = seg("ssum", HK, HK)              # block-diag ones (K x K per head)
    bo = seg("bo", 1, D)

    x2d = x_ref[...]                                               # (B*N, D)

    # Three clean MXU pushes; no 32-lane mid-vreg slices of a fused QKV output.
    q = jnp.dot(x2d, wq, preferred_element_type=f32).reshape(B, N, HD)
    ky = jnp.dot(x2d, wk, preferred_element_type=f32).reshape(B, N, HD)
    vl = jnp.dot(x2d, wv, preferred_element_type=f32).reshape(B, N, HD)

    # Linformer sequence-length projection, emitted pre-tiled over heads and masked
    # block-diagonally:  kbd[b, j, h*K+kk] = (sum_n ky[b,n,j] * proj_k[n,kk]) * [j//Dh == h]
    dn_nk = (((1,), (0,)), ((), ()))                               # contract N
    kbd = lax.dot_general(ky, pk_t, dimension_numbers=dn_nk,
                          preferred_element_type=f32) * mask       # (B, HD, HK)
    vbd = lax.dot_general(vl, pv_t, dimension_numbers=dn_nk,
                          preferred_element_type=f32) * mask       # (B, HD, HK)

    # Scores for ALL heads from one batched push per batch (heads stay in lanes).
    dn_sc = (((2,), (1,)), ((0,), (0,)))                           # contract HD
    scores = lax.dot_general(q, kbd, dimension_numbers=dn_sc,
                             preferred_element_type=f32)           # (B, N, HK)

    # Segmented softmax over each head's K lanes.  Subtracting the per-row (all-head)
    # max is exact for every head's softmax and keeps exp args <= 0; per-head sums are
    # broadcast in-group with one block-diagonal-ones matmul (no lane relayout).
    s2 = scores.reshape(B * N, HK)
    m = jnp.max(s2, axis=-1, keepdims=True)
    e = jnp.exp(s2 - m)
    denom = jnp.dot(e, ssum, preferred_element_type=f32)           # (B*N, HK)
    attn = e * pl.reciprocal(denom, approx=False)                  # exact on f32 path
    attn = attn.reshape(B, N, HK)
    # dropout(p=0.0) is the identity.
    # TODO(synk): nonzero dropout would need pltpu.prng_seed / prng_random_bits.

    # attn @ V with heads still folded into lanes: contract the H*K lanes against the
    # block-diagonal V; output lands directly in (B, N, H*Dh) order -- no head merge
    # transpose needed.
    dn_av = (((2,), (2,)), ((0,), (0,)))
    out = lax.dot_general(attn, vbd, dimension_numbers=dn_av,
                          preferred_element_type=f32)              # (B, N, HD)

    y = jnp.dot(out.reshape(B * N, HD), wo, preferred_element_type=f32) + bo
    o_ref[...] = y.astype(o_ref.dtype)


# ------------------------------ Wrapper ----------------------------------- #

def _pack_params(params, *, heads, dim_head, dtype=jnp.float32):
    """Pack all weights/constants into one slab (single copy-in DMA).

    Every segment's row offset is kept 8-aligned so the in-kernel slices are clean
    sublane-aligned loads.  Static transforms (scale fold, head tiling, masks) are
    done here, once, outside the kernel.
    """
    d, hd = params["wq"].shape
    n, k = params["proj_k"].shape
    hk = heads * k
    scale = dim_head ** (-0.5)

    wq = params["wq"] * scale                                  # fold softmax scale
    wk = params["wk"]
    wv = params["wv"]
    wo = params["wo"]
    bo = params["bo"].reshape(1, d)

    pk_t = jnp.tile(params["proj_k"], (1, heads))              # (N, H*K)
    pv_t = jnp.tile(params["proj_v"], (1, heads))              # (N, H*K)

    head_of_col = jnp.arange(hd) // dim_head                   # (HD,)
    head_of_lane = jnp.arange(hk) // k                         # (HK,)
    mask = (head_of_col[:, None] == head_of_lane[None, :]).astype(dtype)   # (HD, HK)
    ssum = (head_of_lane[:, None] == head_of_lane[None, :]).astype(dtype)  # (HK, HK)

    segs = [("wq", wq), ("wk", wk), ("wv", wv), ("wo", wo),
            ("pk", pk_t), ("pv", pv_t), ("mask", mask), ("ssum", ssum), ("bo", bo)]
    width = max(a.shape[1] for _, a in segs)

    offs, rows, pieces = {}, 0, []
    for name, a in segs:
        a = a.astype(dtype)
        if a.shape[1] < width:
            a = jnp.pad(a, ((0, 0), (0, width - a.shape[1])))
        pad_r = (-a.shape[0]) % 8                              # keep offsets 8-aligned
        if pad_r:
            a = jnp.pad(a, ((0, pad_r), (0, 0)))
        offs[name] = rows
        rows += a.shape[0]
        pieces.append(a)
    return jnp.concatenate(pieces, axis=0), offs


def linformer_self_attention(x, params, *, heads, dim_head, H=None, W=None,
                             dtype=jnp.float32):
    """x: (B, N, D). Returns (B, N, D). `H`/`W` mirror the PyTorch forward (unused)."""
    b, n, d = x.shape
    k = params["proj_k"].shape[1]

    # NOTE: in production this packing would be done once at init, not per call.
    slab, offs = _pack_params(params, heads=heads, dim_head=dim_head, dtype=dtype)
    x2d = x.reshape(b * n, d).astype(dtype)

    kernel = functools.partial(_linformer_kernel, batch=b, seq_len=n, dim=d,
                               heads=heads, dim_head=dim_head, k=k, offs=offs)

    vmem = pl.BlockSpec(memory_space=pltpu.MemorySpace.VMEM)

    # Single invocation: no grid, the whole problem (a few KiB) stays resident in VMEM;
    # 2 input DMAs (x + packed slab) instead of 6.
    out2d = pl.pallas_call(
        kernel,
        out_shape=jax.ShapeDtypeStruct((b * n, d), dtype),
        in_specs=[vmem, vmem],
        out_specs=vmem,
    )(x2d, slab)

    return out2d.reshape(b, n, d)


# --------------------------- Pure-JAX reference ---------------------------- #

def linformer_reference(x, params, *, heads, dim_head):
    b, n, d = x.shape
    k = params["proj_k"].shape[1]
    q = x @ params["wq"]
    keys = x @ params["wk"]
    vals = x @ params["wv"]
    kp = jnp.einsum("bnd,nk->bkd", keys, params["proj_k"])
    vp = jnp.einsum("bnd,nk->bkd", vals, params["proj_v"])
    qh = q.reshape(b, n, heads, dim_head).transpose(0, 2, 1, 3)
    kh = kp.reshape(b, k, heads, dim_head).transpose(0, 2, 1, 3)
    vh = vp.reshape(b, k, heads, dim_head).transpose(0, 2, 1, 3)
    dots = jnp.einsum("bhnd,bhkd->bhnk", qh, kh) * dim_head ** (-0.5)
    attn = jax.nn.softmax(dots, axis=-1)
    out = jnp.einsum("bhnk,bhkd->bhnd", attn, vh)
    out = out.transpose(0, 2, 1, 3).reshape(b, n, heads * dim_head)
    return out @ params["wo"] + params["bo"]


# ------------------------------- Main -------------------------------------- #

if __name__ == "__main__":
    # Small, module-consistent config: dim=32, seq_len=16, k=8, heads=4, dim_head=8.
    B, N, DIM = 2, 16, 32
    HEADS, DIM_HEAD, K = 4, 8, 8
    HD = HEADS * DIM_HEAD

    key = jax.random.PRNGKey(0)
    ks = jax.random.split(key, 8)

    def uniform_init(k_, shape, fan):
        std = 1.0 / math.sqrt(fan)
        return jax.random.uniform(k_, shape, jnp.float32, -std, std)

    # Deterministic synthetic parameters (shapes from the module __init__).
    params = {
        "wq": uniform_init(ks[0], (DIM, HD), DIM),       # to_q (in, out)
        "wk": uniform_init(ks[1], (DIM, HD), DIM),       # to_k
        "wv": uniform_init(ks[2], (DIM, HD), DIM),       # to_v (share_kv=False)
        "proj_k": uniform_init(ks[3], (N, K), K),        # init_() uses last-dim fan
        "proj_v": uniform_init(ks[4], (N, K), K),
        "wo": uniform_init(ks[5], (HD, DIM), HD),        # to_out (in, out)
        "bo": uniform_init(ks[6], (DIM,), HD),           # to_out bias
    }

    x = jax.random.normal(ks[7], (B, N, DIM), jnp.float32)

    ref = linformer_reference(x, params, heads=HEADS, dim_head=DIM_HEAD)

    out = linformer_self_attention(x, params, heads=HEADS, dim_head=DIM_HEAD,
                                   H=4, W=4)
    out = jax.block_until_ready(out)
    assert out.shape == (B, N, DIM)
    assert jnp.allclose(out, ref, atol=5e-5, rtol=5e-5), "mismatch vs reference"

    # TODO(synk): MemTracker / gpu_tracker from the original module is a profiling
    # side effect with no Pallas equivalent; intentionally omitted.
    print("KERNEL_OK")
</pallas_src>

<mosaic_0001>
module attributes {stable_mosaic.version = 11 : i64} {
  func.func @_linformer_kernel(%arg0: memref<32x32xf32, #tpu.memory_space<vmem>>, %arg1: memref<232x32xf32, #tpu.memory_space<vmem>>, %arg2: memref<32x32xf32, #tpu.memory_space<vmem>>) attributes {dimension_semantics = [], scalar_prefetch = 0 : i64, scratch_operands = 0 : i64, tpu.core_type = #tpu.core_type<tc>} {
    %c0 = arith.constant 0 : index
    %c0_0 = arith.constant 0 : index
    %0 = vector.load %arg1[%c0, %c0_0] : memref<232x32xf32, #tpu.memory_space<vmem>>, vector<32x32xf32>
    %c32 = arith.constant 32 : index
    %c0_1 = arith.constant 0 : index
    %1 = vector.load %arg1[%c32, %c0_1] : memref<232x32xf32, #tpu.memory_space<vmem>>, vector<32x32xf32>
    %c64 = arith.constant 64 : index
    %c0_2 = arith.constant 0 : index
    %2 = vector.load %arg1[%c64, %c0_2] : memref<232x32xf32, #tpu.memory_space<vmem>>, vector<32x32xf32>
    %c96 = arith.constant 96 : index
    %c0_3 = arith.constant 0 : index
    %3 = vector.load %arg1[%c96, %c0_3] : memref<232x32xf32, #tpu.memory_space<vmem>>, vector<32x32xf32>
    %c128 = arith.constant 128 : index
    %c0_4 = arith.constant 0 : index
    %4 = vector.load %arg1[%c128, %c0_4] : memref<232x32xf32, #tpu.memory_space<vmem>>, vector<16x32xf32>
    %c144 = arith.constant 144 : index
    %c0_5 = arith.constant 0 : index
    %5 = vector.load %arg1[%c144, %c0_5] : memref<232x32xf32, #tpu.memory_space<vmem>>, vector<16x32xf32>
    %c160 = arith.constant 160 : index
    %c0_6 = arith.constant 0 : index
    %6 = vector.load %arg1[%c160, %c0_6] : memref<232x32xf32, #tpu.memory_space<vmem>>, vector<32x32xf32>
    %c192 = arith.constant 192 : index
    %c0_7 = arith.constant 0 : index
    %7 = vector.load %arg1[%c192, %c0_7] : memref<232x32xf32, #tpu.memory_space<vmem>>, vector<32x32xf32>
    %c224 = arith.constant 224 : index
    %c0_8 = arith.constant 0 : index
    %8 = vector.load %arg1[%c224, %c0_8] : memref<232x32xf32, #tpu.memory_space<vmem>>, vector<1x32xf32>
    %c0_9 = arith.constant 0 : index
    %c0_10 = arith.constant 0 : index
    %9 = vector.load %arg0[%c0_9, %c0_10] : memref<32x32xf32, #tpu.memory_space<vmem>>, vector<32x32xf32>
    %cst = arith.constant dense<0.000000e+00> : vector<32x32xf32>
    %10 = tpu.matmul %9, %0, %cst {dimension_numbers = #tpu.dot_dimension_numbers<[1], [0], [0], [1], [0, 0, 1, 1], [], []>} : vector<32x32xf32>, vector<32x32xf32>, vector<32x32xf32> -> vector<32x32xf32>
    %11 = vector.shape_cast %10 : vector<32x32xf32> to vector<2x16x32xf32>
    %cst_11 = arith.constant dense<0.000000e+00> : vector<32x32xf32>
    %12 = tpu.matmul %9, %1, %cst_11 {dimension_numbers = #tpu.dot_dimension_numbers<[1], [0], [0], [1], [0, 0, 1, 1], [], []>} : vector<32x32xf32>, vector<32x32xf32>, vector<32x32xf32> -> vector<32x32xf32>
    %13 = vector.shape_cast %12 : vector<32x32xf32> to vector<2x16x32xf32>
    %cst_12 = arith.constant dense<0.000000e+00> : vector<32x32xf32>
    %14 = tpu.matmul %9, %2, %cst_12 {dimension_numbers = #tpu.dot_dimension_numbers<[1], [0], [0], [1], [0, 0, 1, 1], [], []>} : vector<32x32xf32>, vector<32x32xf32>, vector<32x32xf32> -> vector<32x32xf32>
    %15 = vector.shape_cast %14 : vector<32x32xf32> to vector<2x16x32xf32>
    %cst_13 = arith.constant dense<0.000000e+00> : vector<2x32x32xf32>
    %16 = tpu.matmul %13, %4, %cst_13 {dimension_numbers = #tpu.dot_dimension_numbers<[1], [0], [0, 2], [1], [0, 0, 0, 2, 1, 1], [], []>} : vector<2x16x32xf32>, vector<16x32xf32>, vector<2x32x32xf32> -> vector<2x32x32xf32>
    %17 = vector.shape_cast %6 : vector<32x32xf32> to vector<1x32x32xf32>
    %18 = vector.broadcast %17 : vector<1x32x32xf32> to vector<2x32x32xf32>
    %19 = arith.mulf %16, %18 : vector<2x32x32xf32>
    %cst_14 = arith.constant dense<0.000000e+00> : vector<2x32x32xf32>
    %20 = tpu.matmul %15, %5, %cst_14 {dimension_numbers = #tpu.dot_dimension_numbers<[1], [0], [0, 2], [1], [0, 0, 0, 2, 1, 1], [], []>} : vector<2x16x32xf32>, vector<16x32xf32>, vector<2x32x32xf32> -> vector<2x32x32xf32>
    %21 = vector.shape_cast %6 : vector<32x32xf32> to vector<1x32x32xf32>
    %22 = vector.broadcast %21 : vector<1x32x32xf32> to vector<2x32x32xf32>
    %23 = arith.mulf %20, %22 : vector<2x32x32xf32>
    %cst_15 = arith.constant dense<0.000000e+00> : vector<2x16x32xf32>
    %24 = tpu.matmul %11, %19, %cst_15 {dimension_numbers = #tpu.dot_dimension_numbers<[2], [1], [1], [2], [0, 0, 0, 1, 1, 2], [0], [0]>} : vector<2x16x32xf32>, vector<2x32x32xf32>, vector<2x16x32xf32> -> vector<2x16x32xf32>
    %25 = vector.shape_cast %24 : vector<2x16x32xf32> to vector<32x32xf32>
    %cst_16 = arith.constant dense<0xFF800000> : vector<32xf32>
    %26 = vector.multi_reduction <maximumf>, %25, %cst_16 [1] : vector<32x32xf32> to vector<32xf32>
    %27 = vector.shape_cast %26 : vector<32xf32> to vector<32x1xf32>
    %28 = vector.broadcast %27 : vector<32x1xf32> to vector<32x32xf32>
    %29 = arith.subf %25, %28 : vector<32x32xf32>
    %30 = math.exp %29 : vector<32x32xf32>
    %cst_17 = arith.constant dense<0.000000e+00> : vector<32x32xf32>
    %31 = tpu.matmul %30, %7, %cst_17 {dimension_numbers = #tpu.dot_dimension_numbers<[1], [0], [0], [1], [0, 0, 1, 1], [], []>} : vector<32x32xf32>, vector<32x32xf32>, vector<32x32xf32> -> vector<32x32xf32>
    %32 = tpu.reciprocal %31 : vector<32x32xf32> -> vector<32x32xf32>
    %33 = arith.mulf %30, %32 : vector<32x32xf32>
    %34 = vector.shape_cast %33 : vector<32x32xf32> to vector<2x16x32xf32>
    %cst_18 = arith.constant dense<0.000000e+00> : vector<2x16x32xf32>
    %35 = tpu.matmul %34, %23, %cst_18 {dimension_numbers = #tpu.dot_dimension_numbers<[2], [2], [1], [1], [0, 0, 0, 1, 1, 1], [0], [0]>} : vector<2x16x32xf32>, vector<2x32x32xf32>, vector<2x16x32xf32> -> vector<2x16x32xf32>
    %36 = vector.shape_cast %35 : vector<2x16x32xf32> to vector<32x32xf32>
    %cst_19 = arith.constant dense<0.000000e+00> : vector<32x32xf32>
    %37 = tpu.matmul %36, %3, %cst_19 {dimension_numbers = #tpu.dot_dimension_numbers<[1], [0], [0], [1], [0, 0, 1, 1], [], []>} : vector<32x32xf32>, vector<32x32xf32>, vector<32x32xf32> -> vector<32x32xf32>
    %38 = vector.broadcast %8 : vector<1x32xf32> to vector<32x32xf32>
    %39 = arith.addf %37, %38 : vector<32x32xf32>
    %c0_20 = arith.constant 0 : index
    %c0_21 = arith.constant 0 : index
    %40 = vector.load %arg2[%c0_20, %c0_21] : memref<32x32xf32, #tpu.memory_space<vmem>>, vector<32x32xf32>
    tpu.vector_store %arg2[%c0_20, %c0_21], %39 {strides = array<i32>} : memref<32x32xf32, #tpu.memory_space<vmem>>, vector<32x32xf32>,
    return
  }
}

</mosaic_0001>

<bundles_post_ra>
// kernel: tpu_custom_call.1
= control target key start
LH: loop header
LB: loop body
LE: loop exit
PB: predicated region body
PF: predicated region fallthrough
CT: control target
= control target key end

     0   :  { %vm45_vm0 = vcmask 261120   ;;  %s1938_s0 = inlined_call_operand.vmem [shape: f32[32,32], index: 0, kind: input, shape index: {}]   ;;  %s1939_s1 = inlined_call_operand.vmem [shape: f32[232,32], index: 1, kind: input, shape index: {}]   ;;  %s1940_s2 = inlined_call_operand.hbm [shape: f32[32,32], index: 2, kind: output, shape index: {}]  }
   0x1   :  { %v12_v0 = vld [vmem:[%s1939_s1] sm:$0xff]  ;;  %v13_v1 = vld [vmem:[%s1939_s1 + $0x8] sm:$0xff]  ;;  %v14_v2 = vld [vmem:[%s1939_s1 + $0x10] sm:$0xff] }
   0x2   :  { %v1597_v3 = vpack.c.bf16 %v13_v1, %v12_v0  ;;  %v15_v4 = vld [vmem:[%s1939_s1 + $0x18] sm:$0xff]  ;;  %v41_v5 = vld [vmem:[%s1938_s0] sm:$0xff]  ;;  %v17_v8 = vld [vmem:[%s1939_s1 + $0x28] sm:$0xff] }
   0x3   :  { %v1601_v6 = vpack.c.bf16 %v15_v4, %v14_v2  ;;  %1459 = vmatprep.mubr.msk.f32.mxu1 %vm45_vm0, %v41_v5  ;;  %v16_v7 = vld [vmem:[%s1939_s1 + $0x20] sm:$0xff]  ;;  %1487 = vmatprep.mubr.msk.f32.mxu0 %vm45_vm0, %v41_v5  ;;  %v21_v10 = vld [vmem:[%s1939_s1 + $0x48] sm:$0xff]  ;;  %v22_v11 = vld [vmem:[%s1939_s1 + $0x50] sm:$0xff] }
   0x4   :  { %1598 = vmatprep.subr.bf16.mxu1 %v1597_v3  ;;  %v20_v9 = vld [vmem:[%s1939_s1 + $0x40] sm:$0xff]  ;;  %v1605_v12 = vpack.c.bf16 %v17_v8, %v16_v7  ;;  %v23_v14 = vld [vmem:[%s1939_s1 + $0x58] sm:$0xff] }
   0x5   :  { %1600 = vmatpush3.bf16.msra.mxu1 %v1597_v3  ;;  %v1613_v13 = vpack.c.bf16 %v21_v10, %v20_v9 }
   0x6   :  { %1602 = vmatprep.subr.bf16.mxu1 %v1601_v6 }
   0x7   :  { %7 = vsyncpa [#allocation3], 0  ;;  %v18_v15 = vld [vmem:[%s1939_s1 + $0x30] sm:$0xff]  ;;  %v19_v16 = vld [vmem:[%s1939_s1 + $0x38] sm:$0xff]  ;;  %v1617_v17 = vpack.c.bf16 %v23_v14, %v22_v11  ;;  %1614 = vmatprep.subr.bf16.mxu0 %v1613_v13  ;;  %vm377_vm1 = vcmask 130048   ;;  %s1729_s17 = smov [#allocation2]  }
   0x8   :  { %v42_v18 = vld [vmem:[%s1938_s0 + $0x8] sm:$0xff]  ;;  %1616 = vmatpush3.bf16.msra.mxu0 %v1613_v13  ;;  %v43_v19 = vld [vmem:[%s1938_s0 + $0x10] sm:$0xff]  ;;  %v1609_v20 = vpack.c.bf16 %v19_v16, %v18_v15  ;;  %v44_v21 = vld [vmem:[%s1938_s0 + $0x18] sm:$0xff]  ;;  %s1303_s18 = sshll.u32 %s1729_s17, 4  ;;  %s1304_s18 = int_to_ptr.vmem [resolvable:$true] %s1303_s18 }
   0x9   :  { %1604 = vmatpush3.bf16.msra.mxu1 %v1601_v6  ;;  %1618 = vmatprep.subr.bf16.mxu0 %v1617_v17  ;;  %v28_v29 = vld [vmem:[%s1939_s1 + $0x80] sm:$0xff]  ;;  %v29_v30 = vld [vmem:[%s1939_s1 + $0x88] sm:$0xff]  ;;  %v30_v37 = vld [vmem:[%s1939_s1 + $0x90] sm:$0xff]  ;;  %p1710_p1 = scmp.lt.s32.totalorder %s1304_s18, %s1304_s18 }
   0xa   :  { %1606 = vmatprep.subr.bf16.mxu1 %v1605_v12  ;;  %v1621_v32 = vpack.c.bf16 %v29_v30, %v28_v29  ;;  %v31_v38 = vld [vmem:[%s1939_s1 + $0x98] sm:$0xff]  ;;  %v33_v56 = vld [vmem:[%s1939_s1 + $0xa8] sm:$0xff]  ;;  %v32_v57 = vld [vmem:[%s1939_s1 + $0xa0] sm:$0xff] }
   0xb   :  { %v1625_v39 = vpack.c.bf16 %v31_v38, %v30_v37  ;;  %v35_v63 = vld [vmem:[%s1939_s1 + $0xb8] sm:$0xff]  ;;  %v34_v0 = vld [vmem:[%s1939_s1 + $0xb0] sm:$0xff]  ;;  %vm1859_vm2 = vmpackc.low %vm45_vm0, %vm45_vm0 }
   0xc   :  { %1460 = vmatmul.mubr.msk.f32.vlgmr.msra.gmra.mrb[0].mxu1 %vm45_vm0, %v42_v18  ;;  %1620 = vmatpush3.bf16.msra.mxu0 %v1617_v17 }
   0xd   :  { %1608 = vmatpush3.bf16.msra.mxu1 %v1605_v12  ;;  %1462 = vmatprep.mubr.msk.f32.mxu1 %vm45_vm0, %v43_v19 }
   0xe   :  { %1610 = vmatprep.subr.bf16.mxu1 %v1609_v20  ;;  %1626 = vmatprep.subr.bf16.mxu0 %v1625_v39 }
   0xf   :  { %1488 = vmatmul.mubr.msk.f32.vlgmr.msra.gmra.mrb[0].mxu0 %vm45_vm0, %v42_v18 }
  0x10   :  { %1463 = vmatmul.mubr.msk.f32.gmra.mrb[2].mxu1 %vm45_vm0, %v44_v21  ;;  %1490 = vmatprep.mubr.msk.f32.mxu0 %vm45_vm0, %v43_v19 }
  0x11   :  { %1612 = vmatpush3.bf16.msra.mxu1 %v1609_v20  ;;  %1473 = vmatprep.mubr.msk.f32.mxu1 %vm45_vm0, %v41_v5 }
  0x12   :  { %1622 = vmatprep.subr.bf16.mxu1 %v1621_v32  ;;  %1628 = vmatpush3.bf16.msra.mxu0 %v1625_v39 }
  0x13   :  { %1491 = vmatmul.mubr.msk.f32.gmra.mrb[2].mxu0 %vm45_vm0, %v44_v21 }
  0x14   :  { %1474 = vmatmul.mubr.msk.f32.vlgmr.msra.gmra.mrb[4].mxu1 %vm45_vm0, %v42_v18 }
  0x15   :  { %1476 = vmatprep.mubr.msk.f32.mxu1 %vm45_vm0, %v43_v19  ;;  %1624 = vmatpush3.bf16.msra.mxu1 %v1621_v32  ;;  %v39_v32 = vld [vmem:[%s1939_s1 + $0xd8] sm:$0xff] }
  0x18   :  { %1477 = vmatmul.mubr.msk.f32.gmra.mrb[6].mxu1 %vm45_vm0, %v44_v21 }
  0xdf   :  { %v1807_v22 = vpop.f32.mrb[0].mxu1 }
  0xe0   :  { %v124_v23 = vpop.f32.mrb[1].mxu1 }
  0xe2   :  { %v1489_v26 = vpop.f32.mrb[0].mxu0 }
  0xe3   :  { %v1809_v24 = vpop.f32.mrb[2].mxu1  ;;  %v294_v27 = vpop.f32.mrb[1].mxu0 }
  0xe4   :  { %v134_v25 = vpop.f32.mrb[3].mxu1 }
  0xe6   :  { %v1492_v33 = vpop.f32.mrb[2].mxu0 }
  0xe7   :  { %v1475_v28 = vpop.f32.mrb[4].mxu1  ;;  %v304_v34 = vpop.f32.mrb[3].mxu0 }
  0xe8   :  { %v209_v31 = vpop.f32.mrb[5].mxu1 }
  0xe9   :  { %313 = vxpose.xlu0.b32.start [1/2] (short) (narrow) %v209_v31, 32  ;;  %v38_v31 = vld [vmem:[%s1939_s1 + $0xd0] sm:$0xff] }
  0xeb   :  { %v1478_v35 = vpop.f32.mrb[6].mxu1 }
  0xec   :  { %v219_v36 = vpop.f32.mrb[7].mxu1 }
  0xed   :  { %314 = vxpose.xlu0.b32.end [2/2] (short) (narrow) %v1475_v28, 32  ;;  %345 = vxpose.xlu1.b32.start [1/2] (short) (narrow) %v219_v36, 32 }
  0xf1   :  { %346 = vxpose.xlu1.b32.end [2/2] (short) (narrow) %v1478_v35, 32  ;;  %v1649_v35 = vpack.c.bf16 %v39_v32, %v38_v31 }
  0xf6   :  { %515 = vxpose.xlu0.b32.start [1/2] (short) (narrow) %v294_v27, 32 }
  0xfa   :  { %516 = vxpose.xlu0.b32.end [2/2] (short) (narrow) %v1489_v26, 32  ;;  %547 = vxpose.xlu1.b32.start [1/2] (short) (narrow) %v304_v34, 32 }
  0xfe   :  { %548 = vxpose.xlu1.b32.end [2/2] (short) (narrow) %v1492_v33, 32 }
 0x169   :  { %v329_v40 = vpop.trf.xlu0 }
 0x16a   :  { %1497 = vmatprep.mubr.msk.f32.mxu1 %vm377_vm1, %v329_v40 }
 0x16d   :  { %v330_v41 = vpop.trf.xlu0  ;;  %v361_v42 = vpop.trf.xlu1 }
 0x16e   :  { %1498 = vmatmul.mubr.msk.f32.vlgmr.msra.gmra.mrb[8].mxu1 %vm377_vm1, %v330_v41 }
 0x171   :  { %v331_v43 = vpop.trf.xlu0  ;;  %v362_v44 = vpop.trf.xlu1 }
 0x172   :  { %1500 = vmatprep.mubr.msk.f32.mxu1 %vm377_vm1, %v331_v43 }
 0x175   :  { %v332_v45 = vpop.trf.xlu0  ;;  %v363_v46 = vpop.trf.xlu1 }
 0x176   :  { %1501 = vmatmul.mubr.msk.f32.gmra.mrb[10].mxu1 %vm377_vm1, %v332_v45 }
 0x177   :  { %1503 = vmatprep.mubr.msk.f32.mxu1 %vm377_vm1, %v361_v42 }
 0x179   :  { %v531_v47 = vpop.trf.xlu0  ;;  %v364_v48 = vpop.trf.xlu1 }
 0x17a   :  { %1504 = vmatmul.mubr.msk.f32.gmra.mrb[12].mxu1 %vm377_vm1, %v362_v44  ;;  %1513 = vmatprep.mubr.msk.f32.mxu0 %vm377_vm1, %v531_v47 }
 0x17b   :  { %1506 = vmatprep.mubr.msk.f32.mxu1 %vm377_vm1, %v363_v46 }
 0x17d   :  { %v532_v49 = vpop.trf.xlu0  ;;  %v563_v50 = vpop.trf.xlu1 }
 0x17e   :  { %1507 = vmatmul.mubr.msk.f32.gmra.mrb[14].mxu1 %vm377_vm1, %v364_v48  ;;  %1514 = vmatmul.mubr.msk.f32.vlgmr.msra.gmra.mrb[4].mxu0 %vm377_vm1, %v532_v49 }
 0x17f   :  { %1533 = vmatprep.mubr.msk.f32.mxu1 %vm45_vm0, %v124_v23  ;;  %v37_v23 = vld [vmem:[%s1939_s1 + $0xc8] sm:$0xff] }
 0x181   :  { %v533_v51 = vpop.trf.xlu0  ;;  %v564_v52 = vpop.trf.xlu1 }
 0x182   :  { %1516 = vmatprep.mubr.msk.f32.mxu0 %vm377_vm1, %v533_v51 }
 0x185   :  { %v534_v53 = vpop.trf.xlu0  ;;  %v565_v54 = vpop.trf.xlu1 }
 0x186   :  { %1517 = vmatmul.mubr.msk.f32.gmra.mrb[6].mxu0 %vm377_vm1, %v534_v53 }
 0x187   :  { %1519 = vmatprep.mubr.msk.f32.mxu0 %vm377_vm1, %v563_v50 }
 0x189   :  { %v566_v55 = vpop.trf.xlu1 }
 0x18a   :  { %1520 = vmatmul.mubr.msk.f32.gmra.mrb[8].mxu0 %vm377_vm1, %v564_v52 }
 0x18b   :  { %1522 = vmatprep.mubr.msk.f32.mxu0 %vm377_vm1, %v565_v54 }
 0x18e   :  { %1523 = vmatmul.mubr.msk.f32.gmra.mrb[10].mxu0 %vm377_vm1, %v566_v55 }
 0x18f   :  { %1544 = vmatprep.mubr.msk.f32.mxu0 %vm45_vm0, %v134_v25 }
 0x241   :  { %v1499_v58 = vpop.f32.mrb[8].mxu1 }
 0x242   :  { %v508_v59 = vmul.f32 %v1499_v58, %v33_v56  ;;  %v468_v60 = vpop.f32.mrb[9].mxu1 }
 0x243   :  { %v507_v61 = vmul.f32 %v468_v60, %v32_v57 }
 0x245   :  { %v1629_v62 = vpack.c.bf16 %v508_v59, %v507_v61 }
 0x247   :  { %1630 = vmatprep.subr.bf16.mxu1 %v1629_v62 }
 0x248   :  { %1632 = vmatpush3.bf16.msra.mxu1 %v1629_v62 }
 0x249   :  { %v1502_v1 = vpop.f32.mrb[10].mxu1 }
 0x24a   :  { %v510_v2 = vmul.f32 %v1502_v1, %v35_v63  ;;  %v478_v3 = vpop.f32.mrb[11].mxu1 }
 0x24b   :  { %v509_v4 = vmul.f32 %v478_v3, %v34_v0  ;;  %v24_v3 = vld [vmem:[%s1939_s1 + $0x60] sm:$0xff] }
 0x24d   :  { %v1633_v5 = vpack.c.bf16 %v510_v2, %v509_v4  ;;  %v1505_v6 = vpop.f32.mrb[12].mxu1  ;;  %v25_v4 = vld [vmem:[%s1939_s1 + $0x68] sm:$0xff] }
 0x24e   :  { %v512_v7 = vmul.f32 %v1505_v6, %v33_v56  ;;  %v488_v8 = vpop.f32.mrb[13].mxu1 }
 0x24f   :  { %v511_v9 = vmul.f32 %v488_v8, %v32_v57  ;;  %1634 = vmatprep.subr.bf16.mxu1 %v1633_v5 }
 0x250   :  { %1636 = vmatpush3.bf16.msra.mxu1 %v1633_v5  ;;  %v1677_v5 = vpack.c.bf16 %v25_v4, %v24_v3 }
 0x251   :  { %v1637_v10 = vpack.c.bf16 %v512_v7, %v511_v9  ;;  %v1508_v11 = vpop.f32.mrb[14].mxu1  ;;  %v1515_v12 = vpop.f32.mrb[4].mxu0 }
 0x252   :  { %v514_v13 = vmul.f32 %v1508_v11, %v35_v63  ;;  %v498_v14 = vpop.f32.mrb[15].mxu1  ;;  %v709_v15 = vmul.f32 %v1515_v12, %v33_v56  ;;  %v669_v16 = vpop.f32.mrb[5].mxu0  ;;  %v27_v11 = vld [vmem:[%s1939_s1 + $0x78] sm:$0xff] }
 0x253   :  { %v513_v17 = vmul.f32 %v498_v14, %v34_v0  ;;  %1534 = vmatmul.mubr.msk.f32.vlgmr.msra.gmra.mrb[16].mxu1 %vm45_vm0, %v1807_v22  ;;  %1638 = vmatprep.subr.bf16.mxu0 %v1637_v10  ;;  %v708_v18 = vmul.f32 %v669_v16, %v32_v57  ;;  %v36_v22 = vld [vmem:[%s1939_s1 + $0xc0] sm:$0xff] }
 0x254   :  { %1640 = vmatpush3.bf16.msra.mxu0 %v1637_v10  ;;  %v26_v10 = vld [vmem:[%s1939_s1 + $0x70] sm:$0xff] }
 0x255   :  { %v1641_v19 = vpack.c.bf16 %v514_v13, %v513_v17  ;;  %v1653_v20 = vpack.c.bf16 %v709_v15, %v708_v18  ;;  %v1681_v16 = vpack.c.bf16 %v27_v11, %v26_v10 }
 0x257   :  { %1642 = vmatprep.subr.bf16.mxu0 %v1641_v19 }
 0x258   :  { %1644 = vmatpush3.bf16.msra.mxu0 %v1641_v19 }
 0x259   :  { %1655 = vmatprep.subr.msk.bf16.mxu0 %vm1859_vm2, %v1653_v20  ;;  %v1518_v25 = vpop.f32.mrb[6].mxu0 }
 0x25a   :  { %v679_v26 = vpop.f32.mrb[7].mxu0  ;;  %v711_v28 = vmul.f32 %v1518_v25, %v35_v63 }
 0x25b   :  { %1545 = vmatmul.mubr.msk.f32.vlgmr.msra.gmra.mrb[12].mxu0 %vm45_vm0, %v1809_v24  ;;  %v1645_v24 = vpack.c.bf16 %v37_v23, %v36_v22  ;;  %v710_v29 = vmul.f32 %v679_v26, %v34_v0 }
 0x25d   :  { %v1521_v27 = vpop.f32.mrb[8].mxu0  ;;  %1646 = vmatprep.subr.bf16.mxu1 %v1645_v24  ;;  %v1659_v36 = vpack.c.bf16 %v711_v28, %v710_v29 }
 0x25e   :  { %v689_v30 = vpop.f32.mrb[9].mxu0  ;;  %1648 = vmatpush3.bf16.msra.mxu1 %v1645_v24  ;;  %v713_v33 = vmul.f32 %v1521_v27, %v33_v56  ;;  %v1362_v24 = vld [vmem:[%s1939_s1 + $0xe0] ss:$0 sm:$0xff]  ;;  %s1705_s1 = scalar_lea.vmem %s1304_s18, 512 }
 0x25f   :  { %v712_v34 = vmul.f32 %v689_v30, %v32_v57  ;;  %1650 = vmatprep.subr.bf16.mxu1 %v1649_v35  ;;  %p1706_p0 = scmp.ne.s32.totalorder %s1304_s18, %s1705_s1  ;;  %p1711_p2 = scmp.lt.s32.totalorder %s1705_s1, %s1705_s1 }
 0x261   :  { %1658 = vmatpush3.bf16.xpose.msk.msra.mxu0 %vm1859_vm2, %v1653_v20  ;;  %v1665_v37 = vpack.c.bf16 %v713_v33, %v712_v34  ;;  %v1524_v38 = vpop.f32.mrb[10].mxu0  ;;  %p1712_p3 = por %p1711_p2, %p1710_p1 }
 0x262   :  { %1652 = vmatpush3.bf16.msra.mxu1 %v1649_v35  ;;  %1661 = vmatprep.subr.msk.bf16.mxu0 %vm1859_vm2, %v1659_v36  ;;  %v715_v39 = vmul.f32 %v1524_v38, %v35_v63  ;;  %v699_v40 = vpop.f32.mrb[11].mxu0 }
 0x263   :  { %1667 = vmatprep.subr.msk.bf16.mxu1 %vm1859_vm2, %v1665_v37  ;;  %v714_v41 = vmul.f32 %v699_v40, %v34_v0  ;;  %p1713_p4 = pnand %p1712_p3, %p1706_p0 }
 0x265   :  { %v1671_v42 = vpack.c.bf16 %v715_v39, %v714_v41 }
 0x269   :  { %1664 = vmatpush3.bf16.xpose.msk.msra.mxu0 %vm1859_vm2, %v1659_v36 }
 0x26a   :  { %1678 = vmatprep.subr.bf16.mxu0 %v1677_v5 }
 0x326   :  { %v1535_v43 = vpop.f32.mrb[16].mxu1 }
 0x327   :  { %v788_v44 = vpop.f32.mrb[17].mxu1  ;;  %v881_v45 = vsel %vm45_vm0, %v1535_v43, -inf }
 0x328   :  { %882 = vmax.xlane.f32.xlu1 %v881_v45  ;;  %v878_v46 = vsel %vm45_vm0, %v788_v44, -inf }
 0x329   :  { %879 = vmax.xlane.f32.xlu0 %v878_v46 }
 0x32e   :  { %v1546_v47 = vpop.f32.mrb[12].mxu0 }
 0x32f   :  { %v869_v48 = vpop.f32.mrb[13].mxu0  ;;  %v887_v50 = vsel %vm45_vm0, %v1546_v47, -inf }
 0x330   :  { %v884_v49 = vsel %vm45_vm0, %v869_v48, -inf }
 0x331   :  { %885 = vmax.xlane.f32.xlu1 %v884_v49 }
 0x335   :  { %888 = vmax.xlane.f32.xlu1 %v887_v50 }
 0x3b5   :  { %v883_v51 = vpop.xlane.xlu1 %882 }
 0x3b6   :  { %v891_v52 = vsub.f32 %v1535_v43, %v883_v51  ;;  %v880_v53 = vpop.xlane.xlu0 %879 }
 0x3b7   :  { %v890_v54 = vsub.f32 %v788_v44, %v880_v53 }
 0x3b8   :  { %v896_v55 = vmul.f32 1.442695, %v891_v52 }
 0x3b9   :  { %v894_v56 = vmul.f32 1.442695, %v890_v54 }
 0x3bb   :  { %1689 = vpow2.f32 %v894_v56 }
 0x3bc   :  { %1691 = vpow2.f32 %v896_v55 }
 0x3be   :  { %v886_v57 = vpop.xlane.xlu1 %885 }
 0x3bf   :  { %v892_v58 = vsub.f32 %v869_v48, %v886_v57 }
 0x3c1   :  { %v898_v59 = vmul.f32 1.442695, %v892_v58 }
 0x3c2   :  { %v889_v60 = vpop.xlane.xlu1 %888 }
 0x3c3   :  { %1693 = vpow2.f32 %v898_v59  ;;  %v893_v61 = vsub.f32 %v1546_v47, %v889_v60 }
 0x3c5   :  { %v1690_v62 = vpop.eup %1689  ;;  %v900_v63 = vmul.f32 1.442695, %v893_v61 }
 0x3c6   :  { %v1692_v0 = vpop.eup %1691  ;;  %1555 = vmatprep.mubr.msk.f32.mxu1 %vm45_vm0, %v1690_v62 }
 0x3c7   :  { %1695 = vpow2.f32 %v900_v63  ;;  %1556 = vmatmul.mubr.msk.f32.vlgmr.msra.gmra.mrb[18].mxu1 %vm45_vm0, %v1692_v0 }
 0x3c8   :  { %1670 = vmatpush3.bf16.xpose.msk.msra.mxu1 %vm1859_vm2, %v1665_v37 }
 0x3c9   :  { %1673 = vmatprep.subr.msk.bf16.mxu1 %vm1859_vm2, %v1671_v42 }
 0x3cd   :  { %v1694_v1 = vpop.eup %1693 }
 0x3ce   :  { %1558 = vmatprep.mubr.msk.f32.mxu1 %vm45_vm0, %v1694_v1 }
 0x3d0   :  { %1676 = vmatpush3.bf16.xpose.msk.msra.mxu1 %vm1859_vm2, %v1671_v42 }
 0x3d1   :  { %v1696_v2 = vpop.eup %1695 }
 0x3d2   :  { %1559 = vmatmul.mubr.msk.f32.gmra.mrb[20].mxu1 %vm45_vm0, %v1696_v2 }
 0x49a   :  { %v1557_v6 = vpop.f32.mrb[18].mxu1 }
 0x49b   :  { %1697 = vrcp.f32 %v1557_v6  ;;  %v980_v7 = vpop.f32.mrb[19].mxu1 }
 0x49c   :  { %1699 = vrcp.f32 %v980_v7 }
 0x4a5   :  { %v1698_v8 = vpop.eup %1697  ;;  %v1560_v9 = vpop.f32.mrb[20].mxu1 }
 0x4a6   :  { %v1700_v12 = vpop.eup %1699  ;;  %1701 = vrcp.f32 %v1560_v9  ;;  %v990_v13 = vpop.f32.mrb[21].mxu1  ;;  %v1004_v15 = vmul.f32 %v1698_v8, %v1692_v0 }
 0x4a7   :  { %1703 = vrcp.f32 %v990_v13  ;;  %v1003_v14 = vmul.f32 %v1700_v12, %v1690_v62 }
 0x4a9   :  { %1569 = vmatprep.mubr.msk.f32.mxu0 %vm45_vm0, %v1003_v14 }
 0x4aa   :  { %1570 = vmatmul.mubr.msk.f32.vlgmr.msra.gmra.mrb[14].mxu0 %vm45_vm0, %v1004_v15 }
 0x4ab   :  { %1680 = vmatpush3.bf16.msra.mxu0 %v1677_v5 }
 0x4ac   :  { %1682 = vmatprep.subr.bf16.mxu0 %v1681_v16 }
 0x4af   :  { %1684 = vmatpush3.bf16.msra.mxu0 %v1681_v16 }
 0x4b0   :  { %v1702_v17 = vpop.eup %1701 }
 0x4b1   :  { %v1704_v18 = vpop.eup %1703  ;;  %v1006_v20 = vmul.f32 %v1702_v17, %v1696_v2 }
 0x4b2   :  { %v1005_v19 = vmul.f32 %v1704_v18, %v1694_v1 }
 0x4b4   :  { %1580 = vmatprep.mubr.msk.f32.mxu1 %vm45_vm0, %v1005_v19 }
 0x4b5   :  { %1581 = vmatmul.mubr.msk.f32.vlgmr.msra.gmra.mrb[22].mxu1 %vm45_vm0, %v1006_v20 }
 0x57d   :  { %v1571_v21 = vpop.f32.mrb[14].mxu0 }
 0x57e   :  { %v1091_v22 = vpop.f32.mrb[15].mxu0 }
 0x57f   :  { %1591 = vmatprep.mubr.msk.f32.mxu0 %vm45_vm0, %v1091_v22 }
 0x580   :  { %1592 = vmatmul.mubr.msk.f32.vlgmr.msra.gmra.mrb[16].mxu0 %vm45_vm0, %v1571_v21 }
 0x588   :  { %v1582_v23 = vpop.f32.mrb[22].mxu1 }
 0x589   :  { %v1184_v25 = vpop.f32.mrb[23].mxu1 }
 0x58a   :  { %1594 = vmatprep.mubr.msk.f32.mxu0 %vm45_vm0, %v1184_v25 }
 0x58b   :  { %1595 = vmatmul.mubr.msk.f32.gmra.mrb[18].mxu0 %vm45_vm0, %v1582_v23 }
 0x653   :  { %v1593_v26 = vpop.f32.mrb[16].mxu0 }
 0x654   :  { %v1281_v27 = vadd.f32 %v1593_v26, %v1362_v24  ;;  %v1275_v28 = vpop.f32.mrb[17].mxu0 }
 0x655   :  { %v1276_v29 = vadd.f32 %v1362_v24, %v1275_v28 }
 0x656   :  { %1295 = vst.msk [vmem:[#allocation2 + $0x8] sm:$0xff] %vm45_vm0, %v1281_v27 }
 0x657   :  { %1294 = vst.msk [vmem:[#allocation2] sm:$0xff] %vm45_vm0, %v1276_v29 }
 0x65e   :  { %v1596_v30 = vpop.f32.mrb[18].mxu0 }
 0x65f   :  { %v1291_v31 = vadd.f32 %v1596_v30, %v1362_v24  ;;  %v1285_v32 = vpop.f32.mrb[19].mxu0 }
 0x660   :  { %v1286_v33 = vadd.f32 %v1362_v24, %v1285_v32 }
 0x661   :  { %1297 = vst.msk [vmem:[#allocation2 + $0x18] sm:$0xff] %vm45_vm0, %v1291_v31 }
 0x662   :  { %1296 = vst.msk [vmem:[#allocation2 + $0x10] sm:$0xff] %vm45_vm0, %v1286_v33 }
 0x663   :  { %1716 = shalt.err (!%p1713_p4)
}
 0x664   :  { %s1717_s21 = scalar_lea.hbm %s1940_s2, 512 }
 0x665   :  { %p1718_p5 = scmp.ne.s32.totalorder %s1940_s2, %s1717_s21  ;;  %p1721_p6 = scmp.lt.u32.totalorder %s1717_s21, %s1940_s2 }
 0x667   :  { %p1723_p7 = pnand %p1721_p6, %p1718_p5 }
 0x669   :  { %1726 = shalt.err (!%p1723_p7)
}
 0x66a   :  { %s1730_s26 = smov 128   ;;  %s1731_s27 = smov 8  }
 0x66b   :  { %1309 = dma.vmem_to_hbm [thread:$0]  %s1304_s18, 512, %s1940_s2, [#allocation3], %s1730_s26, %s1730_s26, %s1731_s27  }
 0x66c   :  { %1727 = dma.done.wait [#allocation3], 512  }
 0x66d   :  { %1728 = vsyncadd [#allocation3], 4294966784 }
 0x66e   :  { %1313 = vsyncpa [#allocation3], 1 }

</bundles_post_ra>
